<compile_context>
chip_gen: v7x
topology: tpu7x:2x2x1
jax: 0.10.0
libtpu: 0.0.40
codegen_flags: <defaults>
</compile_context>

<pallas_src>
import functools

import jax
import jax.numpy as jnp
from jax.experimental import pallas as pl
from jax.experimental.pallas import tpu as pltpu

LANE = 128


def _round_up(n, m):
    return ((n + m - 1) // m) * m


def mlp_kernel(xt_ref, w1t_ref, b1_ref, w2t_ref, b2_ref, w3c_ref, b3_ref, o_ref):
    """Fused 3-layer MLP on a (features, batch_tile) layout.

    xt_ref : (5,  TB)  streamed batch tile (f32 or bf16)
    w1t_ref: (64, 5)   resident             b1_ref: (64, 1) f32
    w2t_ref: (32, 64)  resident             b2_ref: (32, 1) f32
    w3c_ref: (32, 1)   resident f32         b3_ref: (1,)    f32 scalar in SMEM
    o_ref  : (1,  TB)  lane-dense f32 output tile
    """
    xt = xt_ref[...]
    # Layer 1: (64,5) @ (5,TB) -> (64,TB), f32 accumulation on the MXU.
    h1 = jnp.dot(w1t_ref[...], xt, preferred_element_type=jnp.float32)
    h1 = jnp.maximum(h1 + b1_ref[...], 0.0)          # bias + ReLU stay in f32 (VPU)
    # Layer 2: (32,64) @ (64,TB) -> (32,TB).
    h2 = jnp.dot(w2t_ref[...], h1.astype(w2t_ref.dtype),
                 preferred_element_type=jnp.float32)
    h2 = jnp.maximum(h2 + b2_ref[...], 0.0)
    # Layer 3 (32 -> 1): VPU multiply + sublane reduce (XLU) instead of an M=1 matmul
    # that would be >99% MXU padding.
    y = jnp.sum(h2 * w3c_ref[...], axis=0, keepdims=True) + b3_ref[0]
    o_ref[...] = y.astype(o_ref.dtype)


def prepare_params(params):
    """One-time layout plumbing: transpose weights / reshape biases for the kernel."""
    return {
        "w1t": params["w1"].T,              # (64, 5)
        "b1": params["b1"].reshape(-1, 1),  # (64, 1)
        "w2t": params["w2"].T,              # (32, 64)
        "b2": params["b2"].reshape(-1, 1),  # (32, 1)
        "w3c": params["w3"].reshape(-1, 1), # (32, 1)
        "b3": params["b3"].reshape(1),      # (1,)
    }


@functools.partial(jax.jit, static_argnames=("block_batch", "precision"))
def simple_nn_forward(x, prepped, *, block_batch=1024, precision="bf16"):
    """x: (B, 5) float32 -> (B, 1) float32.  `prepped` comes from prepare_params()."""
    B = x.shape[0]
    tb = min(_round_up(block_batch, LANE), _round_up(B, LANE))
    b_pad = _round_up(B, tb)

    mm_dtype = jnp.bfloat16 if precision == "bf16" else jnp.float32

    # Wrapper-side layout plumbing: transpose, pad batch to the tile, cast matmul operands.
    xt = x.T                                            # (5, B)  batch -> lane axis
    if b_pad != B:
        xt = jnp.pad(xt, ((0, 0), (0, b_pad - B)))
    xt = xt.astype(mm_dtype)
    w1t = prepped["w1t"].astype(mm_dtype)
    w2t = prepped["w2t"].astype(mm_dtype)

    out_t = pl.pallas_call(
        mlp_kernel,
        out_shape=jax.ShapeDtypeStruct((1, b_pad), jnp.float32),
        grid_spec=pltpu.PrefetchScalarGridSpec(
            num_scalar_prefetch=0,
            grid=(b_pad // tb,),
            in_specs=[
                pl.BlockSpec((5, tb), lambda i: (0, i)),            # x^T: streamed
                pl.BlockSpec((64, 5), lambda i: (0, 0)),            # w1^T: VMEM-resident
                pl.BlockSpec((64, 1), lambda i: (0, 0)),            # b1
                pl.BlockSpec((32, 64), lambda i: (0, 0)),           # w2^T
                pl.BlockSpec((32, 1), lambda i: (0, 0)),            # b2
                pl.BlockSpec((32, 1), lambda i: (0, 0)),            # w3 column
                pl.BlockSpec(memory_space=pltpu.MemorySpace.SMEM),  # b3 scalar
            ],
            out_specs=pl.BlockSpec((1, tb), lambda i: (0, i)),
        ),
        compiler_params=pltpu.CompilerParams(
            dimension_semantics=("parallel",),  # shard batch tiles across TCs on v7x
        ),
    )(xt, w1t, prepped["b1"], w2t, prepped["b2"], prepped["w3c"], prepped["b3"])

    return out_t[:, :B].T                               # (B, 1)


def init_params(key):
    """Deterministic parameter init matching SimpleNN layer shapes (PyTorch convention,
    weights stored as (in_features, out_features))."""
    ks = jax.random.split(key, 6)

    def uniform(k, shape, fan_in):
        bound = 1.0 / jnp.sqrt(fan_in)
        return jax.random.uniform(k, shape, jnp.float32, -bound, bound)

    return {
        "w1": uniform(ks[0], (5, 64), 5.0),
        "b1": uniform(ks[1], (64,), 5.0),
        "w2": uniform(ks[2], (64, 32), 64.0),
        "b2": uniform(ks[3], (32,), 64.0),
        "w3": uniform(ks[4], (32, 1), 32.0),
        "b3": uniform(ks[5], (1,), 32.0),
    }


def reference_forward(x, params, *, precision="f32"):
    """Pure-JAX reference with the same precision pipeline as the kernel."""
    mm_dtype = jnp.bfloat16 if precision == "bf16" else jnp.float32
    h1 = jnp.dot(x.astype(mm_dtype), params["w1"].astype(mm_dtype),
                 preferred_element_type=jnp.float32) + params["b1"]
    h1 = jnp.maximum(h1, 0.0)
    h2 = jnp.dot(h1.astype(mm_dtype), params["w2"].astype(mm_dtype),
                 preferred_element_type=jnp.float32) + params["b2"]
    h2 = jnp.maximum(h2, 0.0)
    # Layer 3 as an exact f32 multiply-reduce (same math as the kernel's last layer).
    return jnp.sum(h2 * params["w3"].T, axis=-1, keepdims=True) + params["b3"]


if __name__ == "__main__":
    key = jax.random.PRNGKey(0)
    kx, kp = jax.random.split(key)
    params = init_params(kp)
    prepped = prepare_params(params)

    # (1) Small-batch semantic check, full f32 path (matches the PyTorch module).
    B = 8
    x = jax.random.normal(kx, (B, 5), dtype=jnp.float32)
    out = jax.block_until_ready(simple_nn_forward(x, prepped, precision="f32"))
    ref = reference_forward(x, params, precision="f32")
    assert out.shape == (B, 1), out.shape
    assert jnp.allclose(out, ref, atol=1e-5, rtol=1e-5), "f32 mismatch vs reference"

    # (2) Streaming check: non-multiple-of-128 batch, multi-step grid (resident weights,
    #     padded lanes), bf16 matmul operands with f32 accumulation.
    B2 = 333
    x2 = jax.random.normal(kx, (B2, 5), dtype=jnp.float32)
    out2 = jax.block_until_ready(
        simple_nn_forward(x2, prepped, block_batch=128, precision="bf16"))
    ref2 = reference_forward(x2, params, precision="bf16")
    assert out2.shape == (B2, 1), out2.shape
    assert jnp.allclose(out2, ref2, atol=1e-2, rtol=1e-2), "bf16 mismatch vs reference"

    print("KERNEL_OK")
</pallas_src>

<mosaic_0001>
module attributes {stable_mosaic.version = 11 : i64} {
  func.func @mlp_kernel(%arg0: i32, %arg1: memref<5x128xf32, #tpu.memory_space<vmem>>, %arg2: memref<64x5xf32, #tpu.memory_space<vmem>>, %arg3: memref<64x1xf32, #tpu.memory_space<vmem>>, %arg4: memref<32x64xf32, #tpu.memory_space<vmem>>, %arg5: memref<32x1xf32, #tpu.memory_space<vmem>>, %arg6: memref<32x1xf32, #tpu.memory_space<vmem>>, %arg7: memref<1xf32, #tpu.memory_space<smem>>, %arg8: memref<1x128xf32, #tpu.memory_space<vmem>>) attributes {dimension_semantics = [#tpu.dimension_semantics<parallel>], iteration_bounds = array<i64: 1>, scalar_prefetch = 0 : i64, scratch_operands = 0 : i64, tpu.core_type = #tpu.core_type<tc>, window_params = [{transform_indices = @transform_0, window_bounds = array<i64: 5, 128>}, {pipeline_mode = #tpu.pipeline_mode<synchronous>, transform_indices = @transform_1, window_bounds = array<i64: 64, 5>}, {pipeline_mode = #tpu.pipeline_mode<synchronous>, transform_indices = @transform_2, window_bounds = array<i64: 64, 1>}, {pipeline_mode = #tpu.pipeline_mode<synchronous>, transform_indices = @transform_3, window_bounds = array<i64: 32, 64>}, {pipeline_mode = #tpu.pipeline_mode<synchronous>, transform_indices = @transform_4, window_bounds = array<i64: 32, 1>}, {pipeline_mode = #tpu.pipeline_mode<synchronous>, transform_indices = @transform_5, window_bounds = array<i64: 32, 1>}, {transform_indices = @transform_6, window_bounds = array<i64: 1>}, {transform_indices = @transform_7, window_bounds = array<i64: 1, 128>}]} {
    %c0 = arith.constant 0 : index
    %c0_0 = arith.constant 0 : index
    %0 = vector.load %arg1[%c0, %c0_0] : memref<5x128xf32, #tpu.memory_space<vmem>>, vector<5x128xf32>
    %c0_1 = arith.constant 0 : index
    %c0_2 = arith.constant 0 : index
    %1 = vector.load %arg2[%c0_1, %c0_2] : memref<64x5xf32, #tpu.memory_space<vmem>>, vector<64x5xf32>
    %cst = arith.constant dense<0.000000e+00> : vector<64x128xf32>
    %2 = tpu.matmul %1, %0, %cst {dimension_numbers = #tpu.dot_dimension_numbers<[1], [0], [0], [1], [0, 0, 1, 1], [], []>} : vector<64x5xf32>, vector<5x128xf32>, vector<64x128xf32> -> vector<64x128xf32>
    %c0_3 = arith.constant 0 : index
    %c0_4 = arith.constant 0 : index
    %3 = vector.load %arg3[%c0_3, %c0_4] : memref<64x1xf32, #tpu.memory_space<vmem>>, vector<64x1xf32>
    %4 = vector.broadcast %3 : vector<64x1xf32> to vector<64x128xf32>
    %5 = arith.addf %2, %4 : vector<64x128xf32>
    %cst_5 = arith.constant 0.000000e+00 : f32
    %6 = vector.broadcast %cst_5 : f32 to vector<64x128xf32>
    %7 = arith.maximumf %5, %6 : vector<64x128xf32>
    %c0_6 = arith.constant 0 : index
    %c0_7 = arith.constant 0 : index
    %8 = vector.load %arg4[%c0_6, %c0_7] : memref<32x64xf32, #tpu.memory_space<vmem>>, vector<32x64xf32>
    %cst_8 = arith.constant dense<0.000000e+00> : vector<32x128xf32>
    %9 = tpu.matmul %8, %7, %cst_8 {dimension_numbers = #tpu.dot_dimension_numbers<[1], [0], [0], [1], [0, 0, 1, 1], [], []>} : vector<32x64xf32>, vector<64x128xf32>, vector<32x128xf32> -> vector<32x128xf32>
    %c0_9 = arith.constant 0 : index
    %c0_10 = arith.constant 0 : index
    %10 = vector.load %arg5[%c0_9, %c0_10] : memref<32x1xf32, #tpu.memory_space<vmem>>, vector<32x1xf32>
    %11 = vector.broadcast %10 : vector<32x1xf32> to vector<32x128xf32>
    %12 = arith.addf %9, %11 : vector<32x128xf32>
    %cst_11 = arith.constant 0.000000e+00 : f32
    %13 = vector.broadcast %cst_11 : f32 to vector<32x128xf32>
    %14 = arith.maximumf %12, %13 : vector<32x128xf32>
    %c0_12 = arith.constant 0 : index
    %c0_13 = arith.constant 0 : index
    %15 = vector.load %arg6[%c0_12, %c0_13] : memref<32x1xf32, #tpu.memory_space<vmem>>, vector<32x1xf32>
    %16 = vector.broadcast %15 : vector<32x1xf32> to vector<32x128xf32>
    %17 = arith.mulf %14, %16 : vector<32x128xf32>
    %cst_14 = arith.constant dense<0.000000e+00> : vector<128xf32>
    %18 = vector.multi_reduction <add>, %17, %cst_14 [0] : vector<32x128xf32> to vector<128xf32>
    %19 = vector.shape_cast %18 : vector<128xf32> to vector<1x128xf32>
    %c0_15 = arith.constant 0 : index
    %20 = memref.load %arg7[%c0_15] : memref<1xf32, #tpu.memory_space<smem>>
    %21 = vector.broadcast %20 : f32 to vector<1x128xf32>
    %22 = arith.addf %19, %21 : vector<1x128xf32>
    %c0_16 = arith.constant 0 : index
    %c0_17 = arith.constant 0 : index
    %23 = vector.load %arg8[%c0_16, %c0_17] : memref<1x128xf32, #tpu.memory_space<vmem>>, vector<1x128xf32>
    tpu.vector_store %arg8[%c0_16, %c0_17], %22 {strides = array<i32>} : memref<1x128xf32, #tpu.memory_space<vmem>>, vector<1x128xf32>,
    return
  }
  func.func @transform_0(%arg0: i32) -> (i32, i32) {
    %c0_i32 = arith.constant 0 : i32
    %c0_i32_0 = arith.constant 0 : i32
    return %c0_i32, %arg0 : i32, i32
  }
  func.func @transform_1(%arg0: i32) -> (i32, i32) {
    %c0_i32 = arith.constant 0 : i32
    %c0_i32_0 = arith.constant 0 : i32
    %c0_i32_1 = arith.constant 0 : i32
    return %c0_i32, %c0_i32_0 : i32, i32
  }
  func.func @transform_2(%arg0: i32) -> (i32, i32) {
    %c0_i32 = arith.constant 0 : i32
    %c0_i32_0 = arith.constant 0 : i32
    %c0_i32_1 = arith.constant 0 : i32
    return %c0_i32, %c0_i32_0 : i32, i32
  }
  func.func @transform_3(%arg0: i32) -> (i32, i32) {
    %c0_i32 = arith.constant 0 : i32
    %c0_i32_0 = arith.constant 0 : i32
    %c0_i32_1 = arith.constant 0 : i32
    return %c0_i32, %c0_i32_0 : i32, i32
  }
  func.func @transform_4(%arg0: i32) -> (i32, i32) {
    %c0_i32 = arith.constant 0 : i32
    %c0_i32_0 = arith.constant 0 : i32
    %c0_i32_1 = arith.constant 0 : i32
    return %c0_i32, %c0_i32_0 : i32, i32
  }
  func.func @transform_5(%arg0: i32) -> (i32, i32) {
    %c0_i32 = arith.constant 0 : i32
    %c0_i32_0 = arith.constant 0 : i32
    %c0_i32_1 = arith.constant 0 : i32
    return %c0_i32, %c0_i32_0 : i32, i32
  }
  func.func @transform_6(%arg0: i32) -> i32 {
    %c0_i32 = arith.constant 0 : i32
    %c0_i32_0 = arith.constant 0 : i32
    return %c0_i32 : i32
  }
  func.func @transform_7(%arg0: i32) -> (i32, i32) {
    %c0_i32 = arith.constant 0 : i32
    %c0_i32_0 = arith.constant 0 : i32
    return %c0_i32, %arg0 : i32, i32
  }
}

</mosaic_0001>

<bundles_post_ra>
// kernel: simple_nn_forward.1
= control target key start
LH: loop header
LB: loop body
LE: loop exit
PB: predicated region body
PF: predicated region fallthrough
CT: control target
= control target key end

     0   :  { %vm109_vm0 = vcmask 1044480   ;;  %vm84_vm1 = vcmask 39936   ;;  %v498_v3 = vmov 0   ;;  %vm254_vm2 = vcmask 523264   ;;  %s644_s0 = inlined_call_operand.vmem [shape: f32[5,128], index: 0, kind: input, shape index: {}]   ;;  %s645_s1 = inlined_call_operand.vmem [shape: f32[64,5], index: 1, kind: input, shape index: {}]   ;;  %s646_s2 = inlined_call_operand.vmem [shape: f32[64,1], index: 2, kind: input, shape index: {}]   ;;  %s647_s4 = inlined_call_operand.vmem [shape: f32[32,1], index: 4, kind: input, shape index: {}]   ;;  %s648_s5 = inlined_call_operand.vmem [shape: f32[32,1], index: 5, kind: input, shape index: {}]   ;;  %s649_s3 = inlined_call_operand.vmem [shape: f32[32,64], index: 3, kind: input, shape index: {}]   ;;  %s650_s6 = inlined_call_operand.<no memory space> [shape: f32[1], index: 6, kind: input, shape index: {}]   ;;  %s651_s7 = inlined_call_operand.vmem [shape: f32[1,128], index: 7, kind: output, shape index: {}]  }
   0x1   :  { %v27_v0 = vld [vmem:[%s644_s0] sm:$0x1f]  ;;  %v29_v2 = vld [vmem:[%s645_s1 + $0x8] sm:$0xff]  ;;  %496 = vset.pattern.permute.xlu0 %v498_v3  ;;  %497 = vset.pattern.permute.xlu1 %v498_v3  ;;  %v30_v4 = vld [vmem:[%s645_s1 + $0x10] sm:$0xff] }
   0x2   :  { %v28_v1 = vld [vmem:[%s645_s1] sm:$0xff]  ;;  %435 = vmatprep.subr.msk.mxu0 %vm109_vm0, %v27_v0  ;;  %v38_v6 = vld [vmem:[%s646_s2 + $0x10] sm:$0xff]  ;;  %v31_v7 = vld [vmem:[%s645_s1 + $0x18] sm:$0xff] }
   0x3   :  { %437 = vmatprep.mubr.msk.f32.mxu0 %vm84_vm1, %v28_v1  ;;  %436 = vmatpush3.msk.msra.mxu0 %vm109_vm0, %v27_v0  ;;  %v36_v5 = vld [vmem:[%s646_s2] sm:$0xff]  ;;  %v37_v9 = vld [vmem:[%s646_s2 + $0x8] sm:$0xff]  ;;  %v39_v10 = vld [vmem:[%s646_s2 + $0x18] sm:$0xff] }
   0x4   :  { %438 = vmatmul.mubr.msk.f32.vlgmr.msra.gmra.mrb[0].mxu0 %vm84_vm1, %v29_v2  ;;  %46 = vperm.xlu0 %496, %v36_v5   ;;  %v32_v8 = vld [vmem:[%s645_s1 + $0x20] sm:$0xff]  ;;  %v33_v11 = vld [vmem:[%s645_s1 + $0x28] sm:$0xff]  ;;  %v34_v12 = vld [vmem:[%s645_s1 + $0x30] sm:$0xff] }
   0x5   :  { %440 = vmatprep.mubr.msk.f32.mxu0 %vm84_vm1, %v30_v4  ;;  %56 = vperm.xlu1 %497, %v38_v6   ;;  %v40_v13 = vld [vmem:[%s646_s2 + $0x20] sm:$0xff]  ;;  %v41_v14 = vld [vmem:[%s646_s2 + $0x28] sm:$0xff]  ;;  %v35_v15 = vld [vmem:[%s645_s1 + $0x38] sm:$0xff] }
   0x6   :  { %v42_v16 = vld [vmem:[%s646_s2 + $0x30] sm:$0xff]  ;;  %v43_v17 = vld [vmem:[%s646_s2 + $0x38] sm:$0xff]  ;;  %v230_v18 = vld [vmem:[%s647_s4] sm:$0xff] }
   0x7   :  { %v231_v19 = vld [vmem:[%s647_s4 + $0x8] sm:$0xff]  ;;  %v232_v20 = vld [vmem:[%s647_s4 + $0x10] sm:$0xff]  ;;  %v233_v21 = vld [vmem:[%s647_s4 + $0x18] sm:$0xff] }
   0x8   :  { %441 = vmatmul.mubr.msk.f32.gmra.mrb[2].mxu0 %vm84_vm1, %v31_v7  ;;  %51 = vperm.xlu0 %496, %v37_v9   ;;  %v356_v22 = vld [vmem:[%s648_s5] sm:$0xff]  ;;  %v357_v23 = vld [vmem:[%s648_s5 + $0x8] sm:$0xff]  ;;  %v358_v24 = vld [vmem:[%s648_s5 + $0x10] sm:$0xff] }
   0x9   :  { %443 = vmatprep.mubr.msk.f32.mxu0 %vm84_vm1, %v32_v8  ;;  %61 = vperm.xlu1 %497, %v39_v10   ;;  %v359_v25 = vld [vmem:[%s648_s5 + $0x18] sm:$0xff]  ;;  %v226_v26 = vld [vmem:[%s649_s3] sm:$0xff]  ;;  %v228_v27 = vld [vmem:[%s649_s3 + $0x10] sm:$0xff] }
   0xa   :  { %468 = vmatprep.mubr.msk.f32.mxu1 %vm254_vm2, %v228_v27  ;;  %v227_v0 = vld [vmem:[%s649_s3 + $0x8] sm:$0xff]  ;;  %v229_v1 = vld [vmem:[%s649_s3 + $0x18] sm:$0xff] }
   0xc   :  { %444 = vmatmul.mubr.msk.f32.gmra.mrb[4].mxu0 %vm84_vm1, %v33_v11  ;;  %66 = vperm.xlu0 %496, %v40_v13  }
   0xd   :  { %446 = vmatprep.mubr.msk.f32.mxu0 %vm84_vm1, %v34_v12  ;;  %71 = vperm.xlu1 %497, %v41_v14  }
  0x10   :  { %447 = vmatmul.mubr.msk.f32.gmra.mrb[6].mxu0 %vm84_vm1, %v35_v15  ;;  %76 = vperm.xlu0 %496, %v42_v16  }
  0x11   :  { %81 = vperm.xlu1 %497, %v43_v17   ;;  %465 = vmatprep.mubr.msk.f32.mxu0 %vm254_vm2, %v226_v26 }
  0x14   :  { %236 = vperm.xlu0 %496, %v230_v18  }
  0x15   :  { %241 = vperm.xlu1 %497, %v231_v19  }
  0x18   :  { %246 = vperm.xlu0 %496, %v232_v20  }
  0x19   :  { %251 = vperm.xlu1 %497, %v233_v21  }
  0x1c   :  { %362 = vperm.xlu0 %496, %v356_v22  }
  0x1d   :  { %367 = vperm.xlu1 %497, %v357_v23  }
  0x20   :  { %372 = vperm.xlu0 %496, %v358_v24  }
  0x21   :  { %377 = vperm.xlu1 %497, %v359_v25  }
  0x83   :  { %v47_v28 = vpop.permute.xlu0 %46 }
  0x84   :  { %v57_v29 = vpop.permute.xlu1 %56 }
  0x87   :  { %v52_v30 = vpop.permute.xlu0 %51 }
  0x88   :  { %v62_v31 = vpop.permute.xlu1 %61 }
  0x8b   :  { %v67_v44 = vpop.permute.xlu0 %66 }
  0x8c   :  { %v72_v41 = vpop.permute.xlu1 %71 }
  0x8f   :  { %v77_v56 = vpop.permute.xlu0 %76 }
  0x90   :  { %v82_v53 = vpop.permute.xlu1 %81 }
  0x93   :  { %v237_v2 = vpop.permute.xlu0 %236 }
  0x94   :  { %v242_v3 = vpop.permute.xlu1 %241 }
  0x97   :  { %v247_v4 = vpop.permute.xlu0 %246 }
  0x98   :  { %v252_v5 = vpop.permute.xlu1 %251 }
  0x9b   :  { %v363_v6 = vpop.permute.xlu0 %362 }
  0x9c   :  { %v368_v15 = vpop.permute.xlu1 %367 }
  0x9f   :  { %v373_v22 = vpop.permute.xlu0 %372 }
  0xa0   :  { %v378_v25 = vpop.permute.xlu1 %377 }
  0xd7   :  { %v439_v32 = vpop.f32.mrb[0].mxu0 }
  0xd8   :  { %v185_v33 = vadd.f32 %v439_v32, %v52_v30  ;;  %v179_v34 = vpop.f32.mrb[1].mxu0 }
  0xd9   :  { %v180_v35 = vadd.f32 %v179_v34, %v47_v28  ;;  %v394_v34 = vstv %s650_s6 }
  0xda   :  { %v219_v36 = vmax.f32 %v185_v33, 0.0 }
  0xdb   :  { %v218_v37 = vmax.f32 %v180_v35, 0.0  ;;  %v442_v38 = vpop.f32.mrb[2].mxu0 }
  0xdc   :  { %v195_v39 = vadd.f32 %v442_v38, %v62_v31  ;;  %v189_v40 = vpop.f32.mrb[3].mxu0 }
  0xdd   :  { %v471_v42 = vpack.c.bf16 %v219_v36, %v218_v37  ;;  %v190_v43 = vadd.f32 %v189_v40, %v57_v29 }
  0xde   :  { %v221_v45 = vmax.f32 %v195_v39, 0.0 }
  0xdf   :  { %v220_v46 = vmax.f32 %v190_v43, 0.0  ;;  %v445_v47 = vpop.f32.mrb[4].mxu0  ;;  %472 = vmatprep.subr.bf16.mxu0 %v471_v42  ;;  %487 = vmatprep.subr.bf16.mxu1 %v471_v42 }
  0xe0   :  { %v205_v48 = vadd.f32 %v445_v47, %v72_v41  ;;  %v199_v49 = vpop.f32.mrb[5].mxu0  ;;  %474 = vmatpush3.bf16.msra.mxu0 %v471_v42  ;;  %491 = vmatpush3.bf16.msra.mxu1 %v471_v42 }
  0xe1   :  { %v475_v50 = vpack.c.bf16 %v221_v45, %v220_v46  ;;  %v200_v51 = vadd.f32 %v199_v49, %v67_v44 }
  0xe2   :  { %v223_v52 = vmax.f32 %v205_v48, 0.0 }
  0xe3   :  { %v222_v54 = vmax.f32 %v200_v51, 0.0  ;;  %v448_v55 = vpop.f32.mrb[6].mxu0  ;;  %476 = vmatprep.subr.bf16.mxu0 %v475_v50  ;;  %488 = vmatprep.subr.bf16.mxu1 %v475_v50 }
  0xe4   :  { %v215_v57 = vadd.f32 %v448_v55, %v82_v53  ;;  %v209_v58 = vpop.f32.mrb[7].mxu0  ;;  %478 = vmatpush3.bf16.msra.mxu0 %v475_v50  ;;  %492 = vmatpush3.bf16.msra.mxu1 %v475_v50 }
  0xe5   :  { %v479_v59 = vpack.c.bf16 %v223_v52, %v222_v54  ;;  %v210_v60 = vadd.f32 %v209_v58, %v77_v56 }
  0xe6   :  { %v225_v61 = vmax.f32 %v215_v57, 0.0 }
  0xe7   :  { %v224_v62 = vmax.f32 %v210_v60, 0.0  ;;  %480 = vmatprep.subr.bf16.mxu0 %v479_v59  ;;  %489 = vmatprep.subr.bf16.mxu1 %v479_v59 }
  0xe8   :  { %482 = vmatpush3.bf16.msra.mxu0 %v479_v59  ;;  %493 = vmatpush3.bf16.msra.mxu1 %v479_v59 }
  0xe9   :  { %v483_v63 = vpack.c.bf16 %v225_v61, %v224_v62 }
  0xeb   :  { %484 = vmatprep.subr.bf16.mxu0 %v483_v63  ;;  %490 = vmatprep.subr.bf16.mxu1 %v483_v63 }
  0xec   :  { %486 = vmatpush3.bf16.msra.mxu0 %v483_v63  ;;  %494 = vmatpush3.bf16.msra.mxu1 %v483_v63 }
  0xef   :  { %466 = vmatmul.mubr.msk.f32.vlgmr.msra.gmra.mrb[8].mxu0 %vm254_vm2, %v227_v0  ;;  %469 = vmatmul.mubr.msk.f32.vlgmr.msra.gmra.mrb[0].mxu1 %vm254_vm2, %v229_v1 }
 0x1c2   :  { %v467_v7 = vpop.f32.mrb[8].mxu0  ;;  %v470_v8 = vpop.f32.mrb[0].mxu1 }
 0x1c3   :  { %v339_v9 = vadd.f32 %v467_v7, %v242_v3  ;;  %v333_v10 = vpop.f32.mrb[9].mxu0  ;;  %v343_v11 = vpop.f32.mrb[1].mxu1  ;;  %v349_v12 = vadd.f32 %v470_v8, %v252_v5 }
 0x1c4   :  { %v334_v13 = vadd.f32 %v333_v10, %v237_v2  ;;  %v344_v14 = vadd.f32 %v343_v11, %v247_v4 }
 0x1c5   :  { %v353_v16 = vmax.f32 %v339_v9, 0.0  ;;  %v355_v20 = vmax.f32 %v349_v12, 0.0 }
 0x1c6   :  { %v352_v17 = vmax.f32 %v334_v13, 0.0  ;;  %v354_v18 = vmax.f32 %v344_v14, 0.0 }
 0x1c7   :  { %v381_v19 = vmul.f32 %v368_v15, %v353_v16  ;;  %v383_v26 = vmul.f32 %v378_v25, %v355_v20 }
 0x1c8   :  { %v380_v21 = vmul.f32 %v363_v6, %v352_v17  ;;  %v382_v24 = vmul.f32 %v373_v22, %v354_v18 }
 0x1ca   :  { %v384_v23 = vadd.f32 %v381_v19, %v380_v21 }
 0x1cc   :  { %v385_v27 = vadd.f32 %v384_v23, %v382_v24 }
 0x1ce   :  { %v386_v28 = vadd.f32 %v385_v27, %v383_v26 }
 0x1d0   :  { %v387_v29 = vrot.slane %v386_v28, 4 }
 0x1d2   :  { %v388_v30 = vadd.f32 %v387_v29, %v386_v28 }
 0x1d4   :  { %v389_v31 = vrot.slane %v388_v30, 2 }
 0x1d6   :  { %v390_v32 = vadd.f32 %v389_v31, %v388_v30 }
 0x1d8   :  { %v391_v33 = vrot.slane %v390_v32, 1 }
 0x1da   :  { %v392_v35 = vadd.f32 %v391_v33, %v390_v32 }
 0x1dc   :  { %v395_v36 = vadd.f32 %v394_v34, %v392_v35 }
 0x1de   :  { %396 = vst [vmem:[%s651_s7] sm:$0x1] %v395_v36 }

</bundles_post_ra>
